<compile_context>
chip_gen: v6e
topology: v6e:2x2x1
jax: 0.10.0
libtpu: 0.0.40
codegen_flags: <defaults>
</compile_context>

<pallas_src>
import functools
import math

import jax
import jax.numpy as jnp
from jax.experimental import pallas as pl
from jax.experimental.pallas import tpu as pltpu

_BBOX_EXP_CLAMP = math.log(1000.0 / 16.0)   # clamp dh/dw before exp (standard EfficientDet)


# ---------------------------------------------------------------------------
# Fused Pallas kernel: one grid step handles a tile_hw-wide tile of pixels.
# ---------------------------------------------------------------------------
def _fused_kernel(x_ref, wf_ref, bf_ref, wh_ref, bh_ref, hs_ref, ws_ref,
                  box_ref, cls_ref, *,
                  num_anchors, num_classes, apad, img_h, img_w, stride):
    a = num_anchors
    t = x_ref.shape[1]
    nreg = 4 * apad

    # ---- backbone: 1x1 convs == matmuls in [out_ch, pixels] layout ----------
    # bf16 operands on the MXU, f32 accumulation, f32 elementwise afterwards.
    feat = jnp.dot(wf_ref[...], x_ref[...], preferred_element_type=jnp.float32)
    feat = jnp.maximum(feat + bf_ref[...], 0.0)                       # ReLU (f32)
    head = jnp.dot(wh_ref[...], feat.astype(jnp.bfloat16),
                   preferred_element_type=jnp.float32)
    head = head + bh_ref[...]                                         # [NHEAD, T] f32

    # ---- anchors generated in-kernel from the lane iota ---------------------
    lane = jax.lax.broadcasted_iota(jnp.int32, (1, t), 1)
    pix = (pl.program_id(0) * t + lane).astype(jnp.float32)           # global pixel idx
    # +0.5 keeps floor() exact even if the divide is lowered as recip-multiply.
    py = jnp.floor((pix + 0.5) / float(img_w))
    px = pix - py * float(img_w)
    cy = (py + 0.5) * stride                                          # anchor y-centers
    cx = (px + 0.5) * stride                                          # anchor x-centers

    # ---- BBoxTransform + symmetric ClipBoxes on (APAD, T) blocks ------------
    dy = head[0 * apad:1 * apad, :]
    dx = head[1 * apad:2 * apad, :]
    dh = jnp.minimum(head[2 * apad:3 * apad, :], _BBOX_EXP_CLAMP)
    dw = jnp.minimum(head[3 * apad:4 * apad, :], _BBOX_EXP_CLAMP)
    ha = hs_ref[...]                                                  # (APAD, 1) anchor heights
    wa = ws_ref[...]                                                  # (APAD, 1) anchor widths
    h_box = jnp.exp(dh) * ha
    w_box = jnp.exp(dw) * wa
    ycenter = dy * ha + cy
    xcenter = dx * wa + cx
    xmin = jnp.clip(xcenter - 0.5 * w_box, 0.0, float(img_w - 1))
    xmax = jnp.clip(xcenter + 0.5 * w_box, 0.0, float(img_w - 1))
    ymin = jnp.clip(ycenter - 0.5 * h_box, 0.0, float(img_h - 1))
    ymax = jnp.clip(ycenter + 0.5 * h_box, 0.0, float(img_h - 1))

    # ---- classification: running max/argmax over class-major blocks ---------
    # sigmoid is monotone -> rank on logits; sigmoid only on survivors (wrapper).
    best = head[nreg:nreg + apad, :]
    classes = jnp.zeros((apad, t), jnp.int32)
    for cidx in range(1, num_classes):                                # static unroll
        cur = head[nreg + cidx * apad:nreg + (cidx + 1) * apad, :]
        upd = cur > best                                              # strict > keeps first max
        best = jnp.where(upd, cur, best)
        classes = jnp.where(upd, cidx, classes)

    # padded anchor rows get a sentinel so the global top-k never selects them.
    row = jax.lax.broadcasted_iota(jnp.int32, (apad, t), 0)
    best = jnp.where(row < a, best, -1e30)

    # ---- lane-dense, 16-sublane-aligned outputs -----------------------------
    box_ref[0] = xmin
    box_ref[1] = ymin
    box_ref[2] = xmax
    box_ref[3] = ymax
    box_ref[4] = best                                                 # score LOGIT plane
    cls_ref[...] = classes


# ---------------------------------------------------------------------------
# Parameter / constant construction (off the critical path).
# ---------------------------------------------------------------------------
def anchor_dims(num_anchors, apad, base_size=4.0):
    """Per-anchor box heights/widths, padded to (APAD, 1)."""
    scales = base_size * (2.0 ** (jnp.arange(3, dtype=jnp.float32) / 3.0))
    ratios = jnp.array([0.5, 1.0, 2.0], jnp.float32)
    assert num_anchors == scales.shape[0] * ratios.shape[0]
    sc, ra = jnp.meshgrid(scales, ratios, indexing="ij")
    hs = (sc * jnp.sqrt(ra)).reshape(-1)
    ws = (sc / jnp.sqrt(ra)).reshape(-1)
    hs_pad = jnp.zeros((apad, 1), jnp.float32).at[:num_anchors, 0].set(hs)
    ws_pad = jnp.zeros((apad, 1), jnp.float32).at[:num_anchors, 0].set(ws)
    return hs_pad, ws_pad


def build_params(key, c_in, feat, num_anchors, num_classes, apad):
    """Weights pre-packed in the transposed layouts the kernel consumes (bf16 MXU operands)."""
    k1, k2, k3 = jax.random.split(key, 3)
    nreg = 4 * apad
    nhead = nreg + num_classes * apad           # reg: component-major; cls: class-major
    wf_t = jax.random.normal(k1, (feat, c_in), jnp.float32) * 0.1
    bf = jnp.zeros((feat, 1), jnp.float32)
    wreg = jax.random.normal(k2, (4, num_anchors, feat), jnp.float32) * 0.05
    wcls = jax.random.normal(k3, (num_classes, num_anchors, feat), jnp.float32) * 0.05
    whead = jnp.zeros((nhead, feat), jnp.float32)
    bhead = jnp.zeros((nhead, 1), jnp.float32)
    for comp in range(4):                                   # dy / dx / dh / dw
        whead = whead.at[comp * apad:comp * apad + num_anchors, :].set(wreg[comp])
    for cidx in range(num_classes):                         # class-major, APAD stride
        r0 = nreg + cidx * apad
        whead = whead.at[r0:r0 + num_anchors, :].set(wcls[cidx])
        bhead = bhead.at[r0:r0 + num_anchors, :].set(-2.0)  # focal-loss prior bias
    return {"wf_t": wf_t.astype(jnp.bfloat16), "bf": bf,
            "whead_t": whead.astype(jnp.bfloat16), "bhead": bhead}


# ---------------------------------------------------------------------------
# End-to-end forward
# ---------------------------------------------------------------------------
def efficientdet_forward(x, params, hs_pad, ws_pad, *, num_anchors, num_classes,
                         apad, score_threshold, max_detections,
                         anchor_stride=1.0, tile_hw=None):
    b, c_in, h, w = x.shape
    assert b == 1, "post-process assumes batch size 1 (as .squeeze(0) implies)"
    hw = h * w

    if tile_hw is None:
        if hw % 128 == 0:
            # Largest 128-multiple divisor of H*W, capped at 1024 lanes (fits the
            # 128 MiB v5e/v6e VMEM comfortably, OK on v7x with the vmem limit
            # below) AND at H*W/2 so the "parallel" grid axis has >= 2 steps and
            # v7x can split it across its two TensorCores.
            cap = max(128, min(1024, hw // 2))
            tile_hw, cand = 128, 128
            while cand <= cap:
                if hw % cand == 0:
                    tile_hw = cand
                cand += 128
        else:
            tile_hw = hw   # TODO(synk): pad H*W to a multiple of 128 instead.
    grid = (hw // tile_hw,)

    feat = params["wf_t"].shape[0]
    nhead = params["whead_t"].shape[0]
    # sigmoid is monotone: sigmoid(z) > t  <=>  z > log(t / (1 - t))
    logit_thresh = float(math.log(score_threshold / (1.0 - score_threshold)))

    # NCHW -> [C, H*W]: free reshape; bf16 halves the streamed input bytes.
    x_t = x[0].reshape(c_in, hw).astype(jnp.bfloat16)

    # TODO(synk): on v7x set pipeline_mode=pl.Buffered(1) on the four resident
    # weight specs (grid-invariant) instead of shrinking tile_hw.
    box, cls = pl.pallas_call(
        functools.partial(_fused_kernel, num_anchors=num_anchors,
                          num_classes=num_classes, apad=apad,
                          img_h=h, img_w=w, stride=anchor_stride),
        out_shape=(jax.ShapeDtypeStruct((5, apad, hw), jnp.float32),
                   jax.ShapeDtypeStruct((apad, hw), jnp.int32)),
        grid=grid,
        in_specs=[
            pl.BlockSpec((c_in, tile_hw), lambda i: (0, i)),   # x tile (bf16)
            pl.BlockSpec((feat, c_in), lambda i: (0, 0)),      # wf (resident, bf16)
            pl.BlockSpec((feat, 1), lambda i: (0, 0)),         # bf
            pl.BlockSpec((nhead, feat), lambda i: (0, 0)),     # fused head W (bf16)
            pl.BlockSpec((nhead, 1), lambda i: (0, 0)),        # fused head b
            pl.BlockSpec((apad, 1), lambda i: (0, 0)),         # anchor heights
            pl.BlockSpec((apad, 1), lambda i: (0, 0)),         # anchor widths
        ],
        out_specs=(pl.BlockSpec((5, apad, tile_hw), lambda i: (0, 0, i)),
                   pl.BlockSpec((apad, tile_hw), lambda i: (0, i))),
        compiler_params=pltpu.CompilerParams(
            dimension_semantics=("parallel",),
            vmem_limit_bytes=48 * 1024 * 1024),
    )(x_t, params["wf_t"], params["bf"], params["whead_t"], params["bhead"],
      hs_pad, ws_pad)

    # flattened candidate index = anchor_row * (H*W) + pixel
    logits_all = box[4].reshape(-1)
    k = min(max_detections, num_anchors * hw)
    # TODO(synk): at real anchor counts (1e5-1e6) do per-tile top-k / candidate
    # compaction inside the kernel so only num_tiles*k candidate records reach
    # HBM and this full-N top_k disappears.
    top_logits, top_idx = jax.lax.top_k(logits_all, k)
    final_boxes = jnp.take(box[:4].reshape(4, -1), top_idx, axis=1).T   # (k, 4)
    final_scores = jnp.where(top_logits > logit_thresh,
                             jax.nn.sigmoid(top_logits),                # exact, k elems only
                             jnp.zeros_like(top_logits))
    final_classes = cls.reshape(-1)[top_idx]
    return final_boxes, final_scores, final_classes


# ---------------------------------------------------------------------------
if __name__ == "__main__":
    key = jax.random.PRNGKey(0)
    kx, kp = jax.random.split(key, 2)

    B, C_IN, H, W = 1, 4, 16, 16
    FEAT = 32
    NUM_ANCHORS = 9        # per spatial location (3 scales x 3 ratios)
    NUM_CLASSES = 8
    APAD = 16              # per-anchor component blocks padded to 2 sublane-tiles
    SCORE_THRESH = 0.05
    MAX_DET = 100

    x = jax.random.normal(kx, (B, C_IN, H, W), jnp.float32)
    params = build_params(kp, C_IN, FEAT, NUM_ANCHORS, NUM_CLASSES, APAD)
    hs_pad, ws_pad = anchor_dims(NUM_ANCHORS, APAD)

    fwd = jax.jit(functools.partial(
        efficientdet_forward,
        num_anchors=NUM_ANCHORS, num_classes=NUM_CLASSES, apad=APAD,
        score_threshold=SCORE_THRESH, max_detections=MAX_DET))

    final_boxes, final_scores, final_classes = fwd(x, params, hs_pad, ws_pad)
    jax.block_until_ready((final_boxes, final_scores, final_classes))

    assert final_boxes.shape == (MAX_DET, 4)
    assert final_scores.shape == (MAX_DET,)
    assert final_classes.shape == (MAX_DET,)
    assert final_classes.dtype == jnp.int32
    assert bool(jnp.all(jnp.isfinite(final_boxes)))
    assert bool(jnp.all(jnp.isfinite(final_scores)))
    assert bool(jnp.all((final_classes >= 0) & (final_classes < NUM_CLASSES)))
    print("KERNEL_OK")
</pallas_src>

<mosaic_0001>
module attributes {stable_mosaic.version = 11 : i64} {
  func.func @_fused_kernel(%arg0: i32, %arg1: memref<4x128xbf16, #tpu.memory_space<vmem>>, %arg2: memref<32x4xbf16, #tpu.memory_space<vmem>>, %arg3: memref<32x1xf32, #tpu.memory_space<vmem>>, %arg4: memref<192x32xbf16, #tpu.memory_space<vmem>>, %arg5: memref<192x1xf32, #tpu.memory_space<vmem>>, %arg6: memref<16x1xf32, #tpu.memory_space<vmem>>, %arg7: memref<16x1xf32, #tpu.memory_space<vmem>>, %arg8: memref<5x16x128xf32, #tpu.memory_space<vmem>>, %arg9: memref<16x128xi32, #tpu.memory_space<vmem>>) attributes {dimension_semantics = [#tpu.dimension_semantics<parallel>], iteration_bounds = array<i64: 2>, scalar_prefetch = 0 : i64, scratch_operands = 0 : i64, tpu.core_type = #tpu.core_type<tc>, window_params = [{transform_indices = @transform_0, window_bounds = array<i64: 4, 128>}, {pipeline_mode = #tpu.pipeline_mode<synchronous>, transform_indices = @transform_1, window_bounds = array<i64: 32, 4>}, {pipeline_mode = #tpu.pipeline_mode<synchronous>, transform_indices = @transform_2, window_bounds = array<i64: 32, 1>}, {pipeline_mode = #tpu.pipeline_mode<synchronous>, transform_indices = @transform_3, window_bounds = array<i64: 192, 32>}, {pipeline_mode = #tpu.pipeline_mode<synchronous>, transform_indices = @transform_4, window_bounds = array<i64: 192, 1>}, {pipeline_mode = #tpu.pipeline_mode<synchronous>, transform_indices = @transform_5, window_bounds = array<i64: 16, 1>}, {pipeline_mode = #tpu.pipeline_mode<synchronous>, transform_indices = @transform_6, window_bounds = array<i64: 16, 1>}, {transform_indices = @transform_7, window_bounds = array<i64: 5, 16, 128>}, {transform_indices = @transform_8, window_bounds = array<i64: 16, 128>}]} {
    %c0 = arith.constant 0 : index
    %c0_0 = arith.constant 0 : index
    %0 = vector.load %arg2[%c0, %c0_0] : memref<32x4xbf16, #tpu.memory_space<vmem>>, vector<32x4xbf16>
    %c0_1 = arith.constant 0 : index
    %c0_2 = arith.constant 0 : index
    %1 = vector.load %arg1[%c0_1, %c0_2] : memref<4x128xbf16, #tpu.memory_space<vmem>>, vector<4x128xbf16>
    %cst = arith.constant dense<0.000000e+00> : vector<32x128xf32>
    %2 = tpu.matmul %0, %1, %cst {dimension_numbers = #tpu.dot_dimension_numbers<[1], [0], [0], [1], [0, 0, 1, 1], [], []>} : vector<32x4xbf16>, vector<4x128xbf16>, vector<32x128xf32> -> vector<32x128xf32>
    %c0_3 = arith.constant 0 : index
    %c0_4 = arith.constant 0 : index
    %3 = vector.load %arg3[%c0_3, %c0_4] : memref<32x1xf32, #tpu.memory_space<vmem>>, vector<32x1xf32>
    %4 = vector.broadcast %3 : vector<32x1xf32> to vector<32x128xf32>
    %5 = arith.addf %2, %4 : vector<32x128xf32>
    %cst_5 = arith.constant 0.000000e+00 : f32
    %6 = vector.broadcast %cst_5 : f32 to vector<32x128xf32>
    %7 = arith.maximumf %5, %6 : vector<32x128xf32>
    %c0_6 = arith.constant 0 : index
    %c0_7 = arith.constant 0 : index
    %8 = vector.load %arg4[%c0_6, %c0_7] : memref<192x32xbf16, #tpu.memory_space<vmem>>, vector<192x32xbf16>
    %9 = arith.truncf %7 : vector<32x128xf32> to vector<32x128xbf16>
    %cst_8 = arith.constant dense<0.000000e+00> : vector<192x128xf32>
    %10 = tpu.matmul %8, %9, %cst_8 {dimension_numbers = #tpu.dot_dimension_numbers<[1], [0], [0], [1], [0, 0, 1, 1], [], []>} : vector<192x32xbf16>, vector<32x128xbf16>, vector<192x128xf32> -> vector<192x128xf32>
    %c0_9 = arith.constant 0 : index
    %c0_10 = arith.constant 0 : index
    %11 = vector.load %arg5[%c0_9, %c0_10] : memref<192x1xf32, #tpu.memory_space<vmem>>, vector<192x1xf32>
    %12 = vector.broadcast %11 : vector<192x1xf32> to vector<192x128xf32>
    %13 = arith.addf %10, %12 : vector<192x128xf32>
    %14 = tpu.iota {dimensions = array<i32: 1>} : vector<1x128xi32>
    %c128_i32 = arith.constant 128 : i32
    %15 = arith.muli %arg0, %c128_i32 : i32
    %16 = vector.broadcast %15 : i32 to vector<1x128xi32>
    %17 = arith.addi %16, %14 : vector<1x128xi32>
    %18 = arith.sitofp %17 : vector<1x128xi32> to vector<1x128xf32>
    %cst_11 = arith.constant 5.000000e-01 : f32
    %19 = vector.broadcast %cst_11 : f32 to vector<1x128xf32>
    %20 = arith.addf %18, %19 : vector<1x128xf32>
    %cst_12 = arith.constant 1.600000e+01 : f32
    %21 = vector.broadcast %cst_12 : f32 to vector<1x128xf32>
    %22 = arith.divf %20, %21 : vector<1x128xf32>
    %23 = math.floor %22 : vector<1x128xf32>
    %cst_13 = arith.constant 1.600000e+01 : f32
    %24 = vector.broadcast %cst_13 : f32 to vector<1x128xf32>
    %25 = arith.mulf %23, %24 : vector<1x128xf32>
    %26 = arith.subf %18, %25 : vector<1x128xf32>
    %cst_14 = arith.constant 5.000000e-01 : f32
    %27 = vector.broadcast %cst_14 : f32 to vector<1x128xf32>
    %28 = arith.addf %23, %27 : vector<1x128xf32>
    %cst_15 = arith.constant 1.000000e+00 : f32
    %29 = vector.broadcast %cst_15 : f32 to vector<1x128xf32>
    %30 = arith.mulf %28, %29 : vector<1x128xf32>
    %cst_16 = arith.constant 5.000000e-01 : f32
    %31 = vector.broadcast %cst_16 : f32 to vector<1x128xf32>
    %32 = arith.addf %26, %31 : vector<1x128xf32>
    %cst_17 = arith.constant 1.000000e+00 : f32
    %33 = vector.broadcast %cst_17 : f32 to vector<1x128xf32>
    %34 = arith.mulf %32, %33 : vector<1x128xf32>
    %35 = vector.extract_strided_slice %13 {offsets = [0, 0], sizes = [16, 128], strides = [1, 1]} : vector<192x128xf32> to vector<16x128xf32>
    %36 = vector.extract_strided_slice %13 {offsets = [16, 0], sizes = [16, 128], strides = [1, 1]} : vector<192x128xf32> to vector<16x128xf32>
    %37 = vector.extract_strided_slice %13 {offsets = [32, 0], sizes = [16, 128], strides = [1, 1]} : vector<192x128xf32> to vector<16x128xf32>
    %cst_18 = arith.constant 4.13516665 : f32
    %38 = vector.broadcast %cst_18 : f32 to vector<16x128xf32>
    %39 = arith.minimumf %37, %38 : vector<16x128xf32>
    %40 = vector.extract_strided_slice %13 {offsets = [48, 0], sizes = [16, 128], strides = [1, 1]} : vector<192x128xf32> to vector<16x128xf32>
    %cst_19 = arith.constant 4.13516665 : f32
    %41 = vector.broadcast %cst_19 : f32 to vector<16x128xf32>
    %42 = arith.minimumf %40, %41 : vector<16x128xf32>
    %c0_20 = arith.constant 0 : index
    %c0_21 = arith.constant 0 : index
    %43 = vector.load %arg6[%c0_20, %c0_21] : memref<16x1xf32, #tpu.memory_space<vmem>>, vector<16x1xf32>
    %c0_22 = arith.constant 0 : index
    %c0_23 = arith.constant 0 : index
    %44 = vector.load %arg7[%c0_22, %c0_23] : memref<16x1xf32, #tpu.memory_space<vmem>>, vector<16x1xf32>
    %45 = math.exp %39 : vector<16x128xf32>
    %46 = vector.broadcast %43 : vector<16x1xf32> to vector<16x128xf32>
    %47 = arith.mulf %45, %46 : vector<16x128xf32>
    %48 = math.exp %42 : vector<16x128xf32>
    %49 = vector.broadcast %44 : vector<16x1xf32> to vector<16x128xf32>
    %50 = arith.mulf %48, %49 : vector<16x128xf32>
    %51 = vector.broadcast %43 : vector<16x1xf32> to vector<16x128xf32>
    %52 = arith.mulf %35, %51 : vector<16x128xf32>
    %53 = vector.broadcast %30 : vector<1x128xf32> to vector<16x128xf32>
    %54 = arith.addf %52, %53 : vector<16x128xf32>
    %55 = vector.broadcast %44 : vector<16x1xf32> to vector<16x128xf32>
    %56 = arith.mulf %36, %55 : vector<16x128xf32>
    %57 = vector.broadcast %34 : vector<1x128xf32> to vector<16x128xf32>
    %58 = arith.addf %56, %57 : vector<16x128xf32>
    %cst_24 = arith.constant 5.000000e-01 : f32
    %59 = vector.broadcast %cst_24 : f32 to vector<16x128xf32>
    %60 = arith.mulf %59, %50 : vector<16x128xf32>
    %61 = arith.subf %58, %60 : vector<16x128xf32>
    %cst_25 = arith.constant 0.000000e+00 : f32
    %cst_26 = arith.constant 1.500000e+01 : f32
    %62 = vector.broadcast %cst_25 : f32 to vector<16x128xf32>
    %63 = arith.maximumf %62, %61 : vector<16x128xf32>
    %64 = vector.broadcast %cst_26 : f32 to vector<16x128xf32>
    %65 = arith.minimumf %64, %63 : vector<16x128xf32>
    %cst_27 = arith.constant 5.000000e-01 : f32
    %66 = vector.broadcast %cst_27 : f32 to vector<16x128xf32>
    %67 = arith.mulf %66, %50 : vector<16x128xf32>
    %68 = arith.addf %58, %67 : vector<16x128xf32>
    %cst_28 = arith.constant 0.000000e+00 : f32
    %cst_29 = arith.constant 1.500000e+01 : f32
    %69 = vector.broadcast %cst_28 : f32 to vector<16x128xf32>
    %70 = arith.maximumf %69, %68 : vector<16x128xf32>
    %71 = vector.broadcast %cst_29 : f32 to vector<16x128xf32>
    %72 = arith.minimumf %71, %70 : vector<16x128xf32>
    %cst_30 = arith.constant 5.000000e-01 : f32
    %73 = vector.broadcast %cst_30 : f32 to vector<16x128xf32>
    %74 = arith.mulf %73, %47 : vector<16x128xf32>
    %75 = arith.subf %54, %74 : vector<16x128xf32>
    %cst_31 = arith.constant 0.000000e+00 : f32
    %cst_32 = arith.constant 1.500000e+01 : f32
    %76 = vector.broadcast %cst_31 : f32 to vector<16x128xf32>
    %77 = arith.maximumf %76, %75 : vector<16x128xf32>
    %78 = vector.broadcast %cst_32 : f32 to vector<16x128xf32>
    %79 = arith.minimumf %78, %77 : vector<16x128xf32>
    %cst_33 = arith.constant 5.000000e-01 : f32
    %80 = vector.broadcast %cst_33 : f32 to vector<16x128xf32>
    %81 = arith.mulf %80, %47 : vector<16x128xf32>
    %82 = arith.addf %54, %81 : vector<16x128xf32>
    %cst_34 = arith.constant 0.000000e+00 : f32
    %cst_35 = arith.constant 1.500000e+01 : f32
    %83 = vector.broadcast %cst_34 : f32 to vector<16x128xf32>
    %84 = arith.maximumf %83, %82 : vector<16x128xf32>
    %85 = vector.broadcast %cst_35 : f32 to vector<16x128xf32>
    %86 = arith.minimumf %85, %84 : vector<16x128xf32>
    %87 = vector.extract_strided_slice %13 {offsets = [64, 0], sizes = [16, 128], strides = [1, 1]} : vector<192x128xf32> to vector<16x128xf32>
    %c0_i32 = arith.constant 0 : i32
    %88 = vector.broadcast %c0_i32 : i32 to vector<16x128xi32>
    %89 = vector.extract_strided_slice %13 {offsets = [80, 0], sizes = [16, 128], strides = [1, 1]} : vector<192x128xf32> to vector<16x128xf32>
    %90 = arith.cmpf ogt, %89, %87 : vector<16x128xf32>
    %91 = arith.select %90, %89, %87 : vector<16x128xi1>, vector<16x128xf32>
    %c1_i32 = arith.constant 1 : i32
    %92 = vector.broadcast %c1_i32 : i32 to vector<16x128xi32>
    %93 = arith.select %90, %92, %88 : vector<16x128xi1>, vector<16x128xi32>
    %94 = vector.extract_strided_slice %13 {offsets = [96, 0], sizes = [16, 128], strides = [1, 1]} : vector<192x128xf32> to vector<16x128xf32>
    %95 = arith.cmpf ogt, %94, %91 : vector<16x128xf32>
    %96 = arith.select %95, %94, %91 : vector<16x128xi1>, vector<16x128xf32>
    %c2_i32 = arith.constant 2 : i32
    %97 = vector.broadcast %c2_i32 : i32 to vector<16x128xi32>
    %98 = arith.select %95, %97, %93 : vector<16x128xi1>, vector<16x128xi32>
    %99 = vector.extract_strided_slice %13 {offsets = [112, 0], sizes = [16, 128], strides = [1, 1]} : vector<192x128xf32> to vector<16x128xf32>
    %100 = arith.cmpf ogt, %99, %96 : vector<16x128xf32>
    %101 = arith.select %100, %99, %96 : vector<16x128xi1>, vector<16x128xf32>
    %c3_i32 = arith.constant 3 : i32
    %102 = vector.broadcast %c3_i32 : i32 to vector<16x128xi32>
    %103 = arith.select %100, %102, %98 : vector<16x128xi1>, vector<16x128xi32>
    %104 = vector.extract_strided_slice %13 {offsets = [128, 0], sizes = [16, 128], strides = [1, 1]} : vector<192x128xf32> to vector<16x128xf32>
    %105 = arith.cmpf ogt, %104, %101 : vector<16x128xf32>
    %106 = arith.select %105, %104, %101 : vector<16x128xi1>, vector<16x128xf32>
    %c4_i32 = arith.constant 4 : i32
    %107 = vector.broadcast %c4_i32 : i32 to vector<16x128xi32>
    %108 = arith.select %105, %107, %103 : vector<16x128xi1>, vector<16x128xi32>
    %109 = vector.extract_strided_slice %13 {offsets = [144, 0], sizes = [16, 128], strides = [1, 1]} : vector<192x128xf32> to vector<16x128xf32>
    %110 = arith.cmpf ogt, %109, %106 : vector<16x128xf32>
    %111 = arith.select %110, %109, %106 : vector<16x128xi1>, vector<16x128xf32>
    %c5_i32 = arith.constant 5 : i32
    %112 = vector.broadcast %c5_i32 : i32 to vector<16x128xi32>
    %113 = arith.select %110, %112, %108 : vector<16x128xi1>, vector<16x128xi32>
    %114 = vector.extract_strided_slice %13 {offsets = [160, 0], sizes = [16, 128], strides = [1, 1]} : vector<192x128xf32> to vector<16x128xf32>
    %115 = arith.cmpf ogt, %114, %111 : vector<16x128xf32>
    %116 = arith.select %115, %114, %111 : vector<16x128xi1>, vector<16x128xf32>
    %c6_i32 = arith.constant 6 : i32
    %117 = vector.broadcast %c6_i32 : i32 to vector<16x128xi32>
    %118 = arith.select %115, %117, %113 : vector<16x128xi1>, vector<16x128xi32>
    %119 = vector.extract_strided_slice %13 {offsets = [176, 0], sizes = [16, 128], strides = [1, 1]} : vector<192x128xf32> to vector<16x128xf32>
    %120 = arith.cmpf ogt, %119, %116 : vector<16x128xf32>
    %121 = arith.select %120, %119, %116 : vector<16x128xi1>, vector<16x128xf32>
    %c7_i32 = arith.constant 7 : i32
    %122 = vector.broadcast %c7_i32 : i32 to vector<16x128xi32>
    %123 = arith.select %120, %122, %118 : vector<16x128xi1>, vector<16x128xi32>
    %124 = tpu.iota {dimensions = array<i32: 0>} : vector<16x128xi32>
    %c9_i32 = arith.constant 9 : i32
    %125 = vector.broadcast %c9_i32 : i32 to vector<16x128xi32>
    %126 = arith.cmpi slt, %124, %125 : vector<16x128xi32>
    %cst_36 = arith.constant -1.000000e+30 : f32
    %127 = vector.broadcast %cst_36 : f32 to vector<16x128xf32>
    %128 = arith.select %126, %121, %127 : vector<16x128xi1>, vector<16x128xf32>
    %c0_37 = arith.constant 0 : index
    %c0_38 = arith.constant 0 : index
    %c0_39 = arith.constant 0 : index
    %129 = vector.load %arg8[%c0_37, %c0_38, %c0_39] : memref<5x16x128xf32, #tpu.memory_space<vmem>>, vector<1x16x128xf32>
    %130 = vector.shape_cast %129 : vector<1x16x128xf32> to vector<16x128xf32>
    %131 = vector.shape_cast %65 : vector<16x128xf32> to vector<1x16x128xf32>
    tpu.vector_store %arg8[%c0_37, %c0_38, %c0_39], %131 {strides = array<i32>} : memref<5x16x128xf32, #tpu.memory_space<vmem>>, vector<1x16x128xf32>,
    %c1 = arith.constant 1 : index
    %c0_40 = arith.constant 0 : index
    %c0_41 = arith.constant 0 : index
    %132 = vector.load %arg8[%c1, %c0_40, %c0_41] : memref<5x16x128xf32, #tpu.memory_space<vmem>>, vector<1x16x128xf32>
    %133 = vector.shape_cast %132 : vector<1x16x128xf32> to vector<16x128xf32>
    %134 = vector.shape_cast %79 : vector<16x128xf32> to vector<1x16x128xf32>
    tpu.vector_store %arg8[%c1, %c0_40, %c0_41], %134 {strides = array<i32>} : memref<5x16x128xf32, #tpu.memory_space<vmem>>, vector<1x16x128xf32>,
    %c2 = arith.constant 2 : index
    %c0_42 = arith.constant 0 : index
    %c0_43 = arith.constant 0 : index
    %135 = vector.load %arg8[%c2, %c0_42, %c0_43] : memref<5x16x128xf32, #tpu.memory_space<vmem>>, vector<1x16x128xf32>
    %136 = vector.shape_cast %135 : vector<1x16x128xf32> to vector<16x128xf32>
    %137 = vector.shape_cast %72 : vector<16x128xf32> to vector<1x16x128xf32>
    tpu.vector_store %arg8[%c2, %c0_42, %c0_43], %137 {strides = array<i32>} : memref<5x16x128xf32, #tpu.memory_space<vmem>>, vector<1x16x128xf32>,
    %c3 = arith.constant 3 : index
    %c0_44 = arith.constant 0 : index
    %c0_45 = arith.constant 0 : index
    %138 = vector.load %arg8[%c3, %c0_44, %c0_45] : memref<5x16x128xf32, #tpu.memory_space<vmem>>, vector<1x16x128xf32>
    %139 = vector.shape_cast %138 : vector<1x16x128xf32> to vector<16x128xf32>
    %140 = vector.shape_cast %86 : vector<16x128xf32> to vector<1x16x128xf32>
    tpu.vector_store %arg8[%c3, %c0_44, %c0_45], %140 {strides = array<i32>} : memref<5x16x128xf32, #tpu.memory_space<vmem>>, vector<1x16x128xf32>,
    %c4 = arith.constant 4 : index
    %c0_46 = arith.constant 0 : index
    %c0_47 = arith.constant 0 : index
    %141 = vector.load %arg8[%c4, %c0_46, %c0_47] : memref<5x16x128xf32, #tpu.memory_space<vmem>>, vector<1x16x128xf32>
    %142 = vector.shape_cast %141 : vector<1x16x128xf32> to vector<16x128xf32>
    %143 = vector.shape_cast %128 : vector<16x128xf32> to vector<1x16x128xf32>
    tpu.vector_store %arg8[%c4, %c0_46, %c0_47], %143 {strides = array<i32>} : memref<5x16x128xf32, #tpu.memory_space<vmem>>, vector<1x16x128xf32>,
    %c0_48 = arith.constant 0 : index
    %c0_49 = arith.constant 0 : index
    %144 = vector.load %arg9[%c0_48, %c0_49] : memref<16x128xi32, #tpu.memory_space<vmem>>, vector<16x128xi32>
    tpu.vector_store %arg9[%c0_48, %c0_49], %123 {strides = array<i32>} : memref<16x128xi32, #tpu.memory_space<vmem>>, vector<16x128xi32>,
    return
  }
  func.func @transform_0(%arg0: i32) -> (i32, i32) {
    %c0_i32 = arith.constant 0 : i32
    %c0_i32_0 = arith.constant 0 : i32
    return %c0_i32, %arg0 : i32, i32
  }
  func.func @transform_1(%arg0: i32) -> (i32, i32) {
    %c0_i32 = arith.constant 0 : i32
    %c0_i32_0 = arith.constant 0 : i32
    %c0_i32_1 = arith.constant 0 : i32
    return %c0_i32, %c0_i32_0 : i32, i32
  }
  func.func @transform_2(%arg0: i32) -> (i32, i32) {
    %c0_i32 = arith.constant 0 : i32
    %c0_i32_0 = arith.constant 0 : i32
    %c0_i32_1 = arith.constant 0 : i32
    return %c0_i32, %c0_i32_0 : i32, i32
  }
  func.func @transform_3(%arg0: i32) -> (i32, i32) {
    %c0_i32 = arith.constant 0 : i32
    %c0_i32_0 = arith.constant 0 : i32
    %c0_i32_1 = arith.constant 0 : i32
    return %c0_i32, %c0_i32_0 : i32, i32
  }
  func.func @transform_4(%arg0: i32) -> (i32, i32) {
    %c0_i32 = arith.constant 0 : i32
    %c0_i32_0 = arith.constant 0 : i32
    %c0_i32_1 = arith.constant 0 : i32
    return %c0_i32, %c0_i32_0 : i32, i32
  }
  func.func @transform_5(%arg0: i32) -> (i32, i32) {
    %c0_i32 = arith.constant 0 : i32
    %c0_i32_0 = arith.constant 0 : i32
    %c0_i32_1 = arith.constant 0 : i32
    return %c0_i32, %c0_i32_0 : i32, i32
  }
  func.func @transform_6(%arg0: i32) -> (i32, i32) {
    %c0_i32 = arith.constant 0 : i32
    %c0_i32_0 = arith.constant 0 : i32
    %c0_i32_1 = arith.constant 0 : i32
    return %c0_i32, %c0_i32_0 : i32, i32
  }
  func.func @transform_7(%arg0: i32) -> (i32, i32, i32) {
    %c0_i32 = arith.constant 0 : i32
    %c0_i32_0 = arith.constant 0 : i32
    %c0_i32_1 = arith.constant 0 : i32
    return %c0_i32, %c0_i32_0, %arg0 : i32, i32, i32
  }
  func.func @transform_8(%arg0: i32) -> (i32, i32) {
    %c0_i32 = arith.constant 0 : i32
    %c0_i32_0 = arith.constant 0 : i32
    return %c0_i32, %arg0 : i32, i32
  }
}

</mosaic_0001>

<bundles_post_ra>
// kernel: efficientdet_forward.1
= control target key start
LH: loop header
LB: loop body
LE: loop exit
PB: predicated region body
PF: predicated region fallthrough
CT: control target
= control target key end

     0   :  { %s1386_s27 = smov 0   ;;  %s1388_s28 = smov 0   ;;  %s1718_s0 = inlined_call_operand.vmem [shape: bf16[4,256], index: 0, kind: input, shape index: {}]   ;;  %s1719_s1 = inlined_call_operand.vmem [shape: bf16[32,4], index: 1, kind: input, shape index: {}]   ;;  %s1720_s2 = inlined_call_operand.vmem [shape: f32[32,1], index: 2, kind: input, shape index: {}]   ;;  %s1721_s3 = inlined_call_operand.vmem [shape: bf16[192,32], index: 3, kind: input, shape index: {}]   ;;  %s1722_s4 = inlined_call_operand.vmem [shape: f32[192,1], index: 4, kind: input, shape index: {}]   ;;  %s1723_s5 = inlined_call_operand.vmem [shape: f32[16,1], index: 5, kind: input, shape index: {}]   ;;  %s1724_s6 = inlined_call_operand.vmem [shape: f32[16,1], index: 6, kind: input, shape index: {}]   ;;  %s1725_s7 = inlined_call_operand.vmem [shape: f32[5,16,256], index: 7, kind: output, shape index: {0}]   ;;  %s1726_s8 = inlined_call_operand.vmem [shape: s32[16,256], index: 8, kind: output, shape index: {1}]  }
   0x1   :  { %s1390_s29 = smov 0  }
   0x2 LB: > { %s1399_s30 = sadd.s32 4294967295, %s1338_s29   ;;  %s1401_s9 = sadd.s32 1, %s1338_s29   ;;  %s1338_s29 = sphi %s1390_s29, %s1730_s29   ;;  %s1334_s28 = sphi %s1388_s28, %s1729_s28   ;;  %s1330_s27 = sphi %s1386_s27, %s1728_s27  }
   0x3   : > { %s175_s10 = ssub.s32 %s1338_s29, %s1401_s9  ;;  %s178_s11 = sadd.s32 1, %s1334_s28 }
   0x4   : > { %p176_p0 = scmp.eq.s32.totalorder %s175_s10, 0  ;;  %p188_p1 = scmp.ne.s32.totalorder %s1334_s28, %s1330_s27 }
   0x5   : > { %p189_p2 = scmp.eq.s32.totalorder %s1399_s30, 1  ;;  %p1165_p3 = scmp.ge.s32.totalorder %s1338_s29, 1 }
   0x6   : > { %s1409_s12 = scalar_select %p176_p0, %s1334_s28, %s178_s11  }
   0x7   : > { %p1411_p4 = por %p189_p2, %p188_p1  ;;  %p264_p5 = scmp.lt.s32.totalorder %s1338_s29, 3 }
   0x9   : > { %p265_p6 = pnand %p1165_p3, %p264_p5 }
   0xa   : > { %p300_p7 = scmp.lt.s32.totalorder (!%p265_p6), %s1399_s30, 1  ;;  %s1196_s15 = sshll.u32 (!%p265_p6), %s1399_s30, 7 }
   0xb   : > { %268 = sbr.rel (%p265_p6) target bundleno = 489 (0x1e9), region = 48 }
  0x10   : > { %v1294_v0 = vld [vmem:[%s1719_s1] sm:$0xff]   ;;  %vm344_vm0 = vcmask 31744   ;;  %s301_s16 = scalar_select %p300_p7, %s1399_s30, 1  ;;  %v312_v1 = vld [vmem:[%s1720_s2 + $0x10] sm:$0xff]  ;;  %v1340_v2 = vmov 0   ;;  %vm351_vm1 = vcmask 1041408  }
  0x11   : > { %1229 = vmatprep.mubr.msk.bf16.mxu0 %vm344_vm0, %v1294_v0  ;;  %1292 = vset.pattern.permute.xlu0 %v1340_v2  ;;  %v310_v3 = vld [vmem:[%s1720_s2] sm:$0xff]  ;;  %v313_v4 = vld [vmem:[%s1720_s2 + $0x18] sm:$0xff]  ;;  %v311_v6 = vld [vmem:[%s1720_s2 + $0x8] sm:$0xff]  ;;  %vm638_vm2 = vcmask 261120   ;;  %s1206_s20 = sshll.u32 (%p1411_p4), %s1399_s30, 3 }
  0x12   : > { %s1167_s21 = sshll.u32 %s301_s16, 1  ;;  %326 = vperm.xlu0 %1292, %v312_v1   ;;  %1293 = vset.pattern.permute.xlu1 %v1340_v2  ;;  %v1295_v8 = vld [vmem:[%s1719_s1 + $0x8] sm:$0xff]   ;;  %v434_v9 = vld [vmem:[%s1722_s4] sm:$0xff]  ;;  %v436_v11 = vld [vmem:[%s1722_s4 + $0x10] sm:$0xff]  ;;  %s291_s16 = sand.u32 1, %s1330_s27  }
  0x13   : > { %s303_s24 = scalar_lea.vmem %s1718_s0, %s1167_s21  ;;  %316 = vperm.xlu1 %1293, %v310_v3   ;;  %v435_v10 = vld [vmem:[%s1722_s4 + $0x8] sm:$0xff]  ;;  %v437_v12 = vld [vmem:[%s1722_s4 + $0x18] sm:$0xff]  ;;  %v438_v13 = vld [vmem:[%s1722_s4 + $0x20] sm:$0xff]  ;;  %s1641_s27 = smul.u32 80, %s291_s16 }
  0x14   : > { %v309_v5 = vld [vmem:[%s303_s24] sm:$0x3]  ;;  %v439_v14 = vld [vmem:[%s1722_s4 + $0x28] sm:$0xff]  ;;  %v440_v15 = vld [vmem:[%s1722_s4 + $0x30] sm:$0xff]  ;;  %s1647_s17 = sshll.u32 %s291_s16, 4  ;;  %s971_s23 = scalar_lea.vmem (%p1411_p4), %s1725_s7, %s1206_s20 }
  0x15   : > { %1265 = vmatprep.subr.msk.bf16.mxu0 %vm351_vm1, %v309_v5  ;;  %v353_v7 = vsel %vm351_vm1, %v309_v5, 0  ;;  %v441_v16 = vld [vmem:[%s1722_s4 + $0x38] sm:$0xff]  ;;  %v443_v17 = vld [vmem:[%s1722_s4 + $0x48] sm:$0xff]  ;;  %v442_v19 = vld [vmem:[%s1722_s4 + $0x40] sm:$0xff]  ;;  %s1662_s18 = scalar_lea.vmem [#allocation2], %s1641_s27  ;;  %s1666_s19 = scalar_lea.vmem [#allocation3], %s1647_s17 }
  0x16   : > { %1228 = vmatpush3.bf16.msra.mxu0 %v353_v7  ;;  %331 = vperm.xlu0 %1292, %v313_v4   ;;  %v445_v18 = vld [vmem:[%s1722_s4 + $0x58] sm:$0xff]  ;;  %v444_v20 = vld [vmem:[%s1722_s4 + $0x50] sm:$0xff]  ;;  %v447_v21 = vld [vmem:[%s1722_s4 + $0x68] sm:$0xff] }
  0x17   : > { %321 = vperm.xlu1 %1293, %v311_v6   ;;  %v446_v22 = vld [vmem:[%s1722_s4 + $0x60] sm:$0xff]  ;;  %v449_v23 = vld [vmem:[%s1722_s4 + $0x78] sm:$0xff]  ;;  %v448_v24 = vld [vmem:[%s1722_s4 + $0x70] sm:$0xff] }
  0x18   : > { %v451_v25 = vld [vmem:[%s1722_s4 + $0x88] sm:$0xff]  ;;  %v450_v26 = vld [vmem:[%s1722_s4 + $0x80] sm:$0xff]  ;;  %v453_v31 = vld [vmem:[%s1722_s4 + $0x98] sm:$0xff] }
  0x19   : > { %1230 = vmatmul.mubr.msk.bf16.vlgmr.msra.gmra.mxu0 %vm344_vm0, %v1295_v8  ;;  %v822_v27 = vld [vmem:[%s1723_s5] sm:$0xff]  ;;  %v823_v28 = vld [vmem:[%s1723_s5 + $0x8] sm:$0xff]  ;;  %v452_v32 = vld [vmem:[%s1722_s4 + $0x90] sm:$0xff] }
  0x1a   : > { %460 = vperm.xlu0 %1292, %v434_v9   ;;  %v824_v29 = vld [vmem:[%s1724_s6] sm:$0xff]  ;;  %v825_v30 = vld [vmem:[%s1724_s6 + $0x8] sm:$0xff]  ;;  %v457_v35 = vld [vmem:[%s1722_s4 + $0xb8] sm:$0xff] }
  0x1b   : > { %465 = vperm.xlu1 %1293, %v435_v10   ;;  %v455_v33 = vld [vmem:[%s1722_s4 + $0xa8] sm:$0xff]  ;;  %v454_v34 = vld [vmem:[%s1722_s4 + $0xa0] sm:$0xff]  ;;  %v456_v36 = vld [vmem:[%s1722_s4 + $0xb0] sm:$0xff] }
  0x1c   : > { %v1296_v37 = vld [vmem:[%s1721_s3] sm:$0xff]   ;;  %v1298_v57 = vld [vmem:[%s1721_s3 + $0x8] sm:$0xff]   ;;  %v1300_v59 = vld [vmem:[%s1721_s3 + $0x10] sm:$0xff]  }
  0x1d   : > { %v1297_v38 = vld [vmem:[%s1721_s3 + $0x20] sm:$0xff]   ;;  %1237 = vmatprep.mubr.msk.bf16.mxu0 %vm638_vm2, %v1296_v37  ;;  %v1299_v58 = vld [vmem:[%s1721_s3 + $0x28] sm:$0xff]   ;;  %v1301_v60 = vld [vmem:[%s1721_s3 + $0x30] sm:$0xff]  }
  0x1e   : > { %470 = vperm.xlu0 %1292, %v436_v11   ;;  %1245 = vmatprep.mubr.msk.bf16.mxu1 %vm638_vm2, %v1297_v38  ;;  %v1302_v61 = vld [vmem:[%s1721_s3 + $0x18] sm:$0xff]   ;;  %v1304_v63 = vld [vmem:[%s1721_s3 + $0x40] sm:$0xff]   ;;  %v1305_v0 = vld [vmem:[%s1721_s3 + $0x48] sm:$0xff]  }
  0x1f   : > { %475 = vperm.xlu1 %1293, %v437_v12   ;;  %v1303_v62 = vld [vmem:[%s1721_s3 + $0x38] sm:$0xff]   ;;  %v1306_v1 = vld [vmem:[%s1721_s3 + $0x50] sm:$0xff]  }
  0x20   : > { %v1307_v3 = vld [vmem:[%s1721_s3 + $0x58] sm:$0xff]  }
  0x22   : > { %480 = vperm.xlu0 %1292, %v438_v13  }
  0x23   : > { %485 = vperm.xlu1 %1293, %v439_v14  }
  0x26   : > { %490 = vperm.xlu0 %1292, %v440_v15   ;;  %v804_v15 = vlaneseq }
  0x27   : > { %495 = vperm.xlu1 %1293, %v441_v16  }
  0x2a   : > { %505 = vperm.xlu0 %1292, %v443_v17  }
  0x2b   : > { %515 = vperm.xlu1 %1293, %v445_v18   ;;  %v805_v18 = vand.u32 127, %v804_v15 }
  0x2e   : > { %500 = vperm.xlu0 %1292, %v442_v19   ;;  %v807_v19 = vstv %s1196_s15 }
  0x2f   : > { %510 = vperm.xlu1 %1293, %v444_v20  }
  0x32   : > { %525 = vperm.xlu0 %1292, %v447_v21  }
  0x33   : > { %520 = vperm.xlu1 %1293, %v446_v22   ;;  %v808_v22 = vadd.s32 %v807_v19, %v805_v18 }
  0x36   : > { %535 = vperm.xlu0 %1292, %v449_v23   ;;  %v809_v23 = vcvt.s32.f32 %v808_v22 }
  0x37   : > { %530 = vperm.xlu1 %1293, %v448_v24  }
  0x3a   : > { %545 = vperm.xlu0 %1292, %v451_v25  }
  0x3b   : > { %540 = vperm.xlu1 %1293, %v450_v26  }
  0x3e   : > { %832 = vperm.xlu0 %1292, %v822_v27   ;;  %v810_v27 = vadd.f32 0.5, %v809_v23 }
  0x3f   : > { %837 = vperm.xlu1 %1293, %v823_v28  }
  0x42   : > { %848 = vperm.xlu0 %1292, %v824_v29  }
  0x43   : > { %853 = vperm.xlu1 %1293, %v825_v30  }
  0x46   : > { %555 = vperm.xlu0 %1292, %v453_v31  }
  0x47   : > { %550 = vperm.xlu1 %1293, %v452_v32  }
  0x4a   : > { %565 = vperm.xlu0 %1292, %v455_v33   ;;  %v812_v33 = vmul.f32 0.0625, %v810_v27 }
  0x4b   : > { %560 = vperm.xlu1 %1293, %v454_v34  }
  0x4e   : > { %575 = vperm.xlu0 %1292, %v457_v35  }
  0x4f   : > { %570 = vperm.xlu1 %1293, %v456_v36  }
  0x8d   : > { %v327_v39 = vpop.permute.xlu0 %326 }
  0x8e   : > { %v317_v40 = vpop.permute.xlu1 %316 }
  0x91   : > { %v332_v44 = vpop.permute.xlu0 %331 }
  0x92   : > { %v322_v48 = vpop.permute.xlu1 %321 }
  0x95   : > { %v1576_v5 = vpop.permute.xlu0 %460 }
  0x96   : > { %v1574_v4 = vpop.permute.xlu1 %465 }
  0x99   : > { %v1580_v7 = vpop.permute.xlu0 %470 }
  0x9a   : > { %v1578_v6 = vpop.permute.xlu1 %475 }
  0x9d   : > { %v481_v9 = vpop.permute.xlu0 %480 }
  0x9e   : > { %v1582_v8 = vpop.permute.xlu1 %485 }
  0xa1   : > { %v491_v11 = vpop.permute.xlu0 %490 }
  0xa2   : > { %v496_v10 = vpop.permute.xlu1 %495 }
  0xa5   : > { %v506_v13 = vpop.permute.xlu0 %505 }
  0xa6   : > { %v516_v12 = vpop.permute.xlu1 %515 }
  0xa9   : > { %v501_v16 = vpop.permute.xlu0 %500 }
  0xaa   : > { %v511_v14 = vpop.permute.xlu1 %510 }
  0xad   : > { %v526_v20 = vpop.permute.xlu0 %525 }
  0xae   : > { %v521_v17 = vpop.permute.xlu1 %520 }
  0xb1   : > { %v536_v24 = vpop.permute.xlu0 %535 }
  0xb2   : > { %v531_v21 = vpop.permute.xlu1 %530 }
  0xb5   : > { %v1588_v31 = vpop.permute.xlu0 %545 }
  0xb6   : > { %v1586_v25 = vpop.permute.xlu1 %540 }
  0xba   : > { %v1590_v32 = vpop.permute.xlu1 %837 }
  0xd9   : > { %v1231_v41 = vpop.f32.mrf.mxu0 }
  0xda   : > { %v398_v43 = vadd.f32 %v1231_v41, %v327_v39 }
  0xdb   : > { %v389_v42 = vpop.f32.mrf.mxu0 }
  0xdc   : > { %v390_v46 = vadd.f32 %v389_v42, %v317_v40  ;;  %v406_v50 = vmax.f32 %v398_v43, 0.0  ;;  %v813_v40 = vfloor.f32 %v812_v33  ;;  %v1596_v43 = vpop.permute.xlu0 %832 }
  0xdd   : > { %v1232_v45 = vpop.f32.mrf.mxu0 }
  0xde   : > { %v401_v47 = vadd.f32 %v1232_v45, %v332_v44  ;;  %v404_v53 = vmax.f32 %v390_v46, 0.0  ;;  %v1598_v44 = vpop.permute.xlu1 %853  ;;  %v1616_v27 = vadd.f32 0.5, %v813_v40 }
  0xdf   : > { %v392_v49 = vpop.f32.mrf.mxu0 }
  0xe0   : > { %v407_v51 = vmax.f32 %v401_v47, 0.0  ;;  %v393_v52 = vadd.f32 %v392_v49, %v322_v48 }
  0xe2   : > { %v433_v54 = vpack.c.bf16 %v407_v51, %v406_v50  ;;  %v405_v55 = vmax.f32 %v393_v52, 0.0  ;;  %v814_v52 = vmul.f32 16.0, %v813_v40 }
  0xe4   : > { %v432_v56 = vpack.c.bf16 %v405_v55, %v404_v53  ;;  %1233 = vmatprep.subr.bf16.mxu0 %v433_v54  ;;  %1261 = vmatprep.subr.bf16.mxu1 %v433_v54 }
  0xe5   : > { %1234 = vmatpush3.bf16.msra.mxu0 %v433_v54  ;;  %1263 = vmatpush3.bf16.msra.mxu1 %v433_v54 }
  0xe6   : > { %1235 = vmatprep.subr.bf16.mxu0 %v432_v56  ;;  %1262 = vmatprep.subr.bf16.mxu1 %v432_v56 }
  0xe9   : > { %1236 = vmatpush3.bf16.msra.mxu0 %v432_v56  ;;  %1264 = vmatpush3.bf16.msra.mxu1 %v432_v56 }
  0xec   : > { %1238 = vmatmul.mubr.msk.bf16.vlgmr.msra.gmra.mxu0 %vm638_vm2, %v1298_v57  ;;  %1246 = vmatmul.mubr.msk.bf16.vlgmr.msra.gmra.mxu1 %vm638_vm2, %v1299_v58 }
  0xed   : > { %1241 = vmatprep.mubr.msk.bf16.mxu0 %vm638_vm2, %v1300_v59  ;;  %1249 = vmatprep.mubr.msk.bf16.mxu1 %vm638_vm2, %v1301_v60 }
  0xf4   : > { %1242 = vmatmul.mubr.msk.bf16.gmra.mxu0 %vm638_vm2, %v1302_v61  ;;  %1250 = vmatmul.mubr.msk.bf16.gmra.mxu1 %vm638_vm2, %v1303_v62 }
  0xf5   : > { %1253 = vmatprep.mubr.msk.bf16.mxu1 %vm638_vm2, %v1304_v63  ;;  %v1605_v63 = vpop.permute.xlu0 %848 }
  0xf9   : > { %v556_v33 = vpop.permute.xlu0 %555 }
  0xfc   : > { %1254 = vmatmul.mubr.msk.bf16.gmra.mxu1 %vm638_vm2, %v1305_v0  ;;  %v551_v0 = vpop.permute.xlu1 %550 }
  0xfd   : > { %1257 = vmatprep.mubr.msk.bf16.mxu1 %vm638_vm2, %v1306_v1 }
 0x104   : > { %1258 = vmatmul.mubr.msk.bf16.gmra.mxu1 %vm638_vm2, %v1307_v3 }
 0x1ac   : > { %v1239_v26 = vpop.f32.mrf.mxu0  ;;  %v1247_v28 = vpop.f32.mrf.mxu1 }
 0x1ad   : > { %v750_v39 = vadd.f32 %v1247_v28, %v511_v14  ;;  %v718_v18 = vadd.f32 %v1239_v26, %v1580_v7  ;;  %v561_v7 = vpop.permute.xlu1 %560 }
 0x1ae   : > { %v709_v29 = vpop.f32.mrf.mxu0  ;;  %v741_v30 = vpop.f32.mrf.mxu1 }
 0x1af   : > { %v742_v36 = vadd.f32 %v741_v30, %v501_v16  ;;  %v710_v19 = vadd.f32 %v709_v29, %v1576_v5 }
 0x1b0   : > { %v1592_v34 = vpop.f32.mrf.mxu0  ;;  %v1248_v35 = vpop.f32.mrf.mxu1 }
 0x1b1   : > { %vm894_vm3 = vcmp.gt.f32.partialorder %v750_v39, %v742_v36  ;;  %v753_v53 = vadd.f32 %v1248_v35, %v516_v12 }
 0x1b2   : > { %v1594_v37 = vpop.f32.mrf.mxu0  ;;  %v744_v38 = vpop.f32.mrf.mxu1  ;;  %v896_v54 = vsel %vm894_vm3, %v750_v39, %v742_v36  ;;  %v898_v5 = vsel %vm894_vm3, 1, %v1340_v2  ;;  %v721_v39 = vadd.f32 %v1592_v34, %v1578_v6 }
 0x1b3   : > { %v1600_v46 = vadd.f32 %v744_v38, %v506_v13  ;;  %v937_v38 = vshrl.u32 %v804_v15, 7 }
 0x1b4   : > { %v1243_v41 = vpop.f32.mrf.mxu0  ;;  %v1251_v42 = vpop.f32.mrf.mxu1 }
 0x1b5   : > { %v734_v45 = vadd.f32 %v1243_v41, %v491_v11  ;;  %vm895_vm5 = vcmp.gt.f32.partialorder %v753_v53, %v1600_v46  ;;  %v815_v11 = vsub.f32 %v809_v23, %v814_v52  ;;  %v766_v12 = vadd.f32 %v1251_v42, %v531_v21 }
 0x1b6   : > { %v725_v47 = vpop.f32.mrf.mxu0  ;;  %v757_v48 = vpop.f32.mrf.mxu1  ;;  %v899_v42 = vsel %vm895_vm5, 1, %v1340_v2  ;;  %v1643_v2 = vadd.s32 8, %v937_v38 }
 0x1b7   : > { %v820_v49 = vmin.f32 %v734_v45, 4.1351666  ;;  %v726_v50 = vadd.f32 %v725_v47, %v481_v9  ;;  %v758_v51 = vadd.f32 %v757_v48, %v521_v17  ;;  %v897_v17 = vsel %vm895_vm5, %v753_v53, %v1600_v46  ;;  %v566_v46 = vpop.permute.xlu0 %565 }
 0x1b8   : > { %v1244_v55 = vpop.f32.mrf.mxu0  ;;  %v1252_v56 = vpop.f32.mrf.mxu1  ;;  %v1614_v21 = vadd.f32 0.5, %v815_v11  ;;  %vm940_vm14 = vcmp.lt.s32.totalorder %v1643_v2, 9 }
 0x1b9   : > { %v842_v57 = vmul.f32 1.442695, %v820_v49  ;;  %v818_v58 = vmin.f32 %v726_v50, 4.1351666  ;;  %vm900_vm4 = vcmp.gt.f32.partialorder %v758_v51, %v896_v54  ;;  %v737_v59 = vadd.f32 %v1244_v55, %v496_v10  ;;  %v571_v50 = vpop.permute.xlu1 %570 }
 0x1ba   : > { %v902_v60 = vsel %vm900_vm4, %v758_v51, %v896_v54  ;;  %v728_v61 = vpop.f32.mrf.mxu0  ;;  %v760_v62 = vpop.f32.mrf.mxu1  ;;  %v904_v29 = vsel %vm900_vm4, 2, %v898_v5 }
 0x1bb   : > { %1308 = vpow2.f32 %v842_v57  ;;  %v826_v1 = vmul.f32 1.442695, %v818_v58  ;;  %v821_v3 = vmin.f32 %v737_v59, 4.1351666  ;;  %v729_v9 = vadd.f32 %v728_v61, %v1582_v8 }
 0x1bc   : > { %v761_v13 = vadd.f32 %v760_v62, %v526_v20  ;;  %v1255_v14 = vpop.f32.mrf.mxu1  ;;  %vm906_vm7 = vcmp.gt.f32.partialorder %v766_v12, %v902_v60  ;;  %v769_v8 = vadd.f32 %v1252_v56, %v536_v24  ;;  %v862_v24 = vmul.f32 %v1605_v63, %v718_v18  ;;  %v576_v18 = vpop.permute.xlu0 %575 }
 0x1bd   : > { %1310 = vpow2.f32 %v826_v1  ;;  %v844_v10 = vmul.f32 1.442695, %v821_v3  ;;  %v819_v16 = vmin.f32 %v729_v9, 4.1351666  ;;  %v908_v26 = vsel %vm906_vm7, %v766_v12, %v902_v60 }
 0x1be   : > { %vm901_vm6 = vcmp.gt.f32.partialorder %v761_v13, %v897_v17  ;;  %v773_v22 = vpop.f32.mrf.mxu1  ;;  %v782_v40 = vadd.f32 %v1255_v14, %v551_v0  ;;  %v910_v48 = vsel %vm906_vm7, 3, %v904_v29  ;;  %v864_v51 = vadd.f32 %v862_v24, %v1614_v21 }
 0x1bf   : > { %1312 = vpow2.f32 %v844_v10  ;;  %v828_v23 = vmul.f32 1.442695, %v819_v16  ;;  %v903_v20 = vsel %vm901_vm6, %v761_v13, %v897_v17  ;;  %v774_v28 = vadd.f32 %v773_v22, %v1586_v25 }
 0x1c0   : > { %v1256_v30 = vpop.f32.mrf.mxu1  ;;  %vm907_vm8 = vcmp.gt.f32.partialorder %v769_v8, %v903_v20  ;;  %v858_v25 = vmul.f32 %v1596_v43, %v710_v19  ;;  %v905_v15 = vsel %vm901_vm6, 2, %v899_v42 }
 0x1c1   : > { %1314 = vpow2.f32 %v828_v23  ;;  %vm912_vm9 = vcmp.gt.f32.partialorder %v774_v28, %v908_v26  ;;  %v909_v45 = vsel %vm907_vm8, %v769_v8, %v903_v20  ;;  %v785_v53 = vadd.f32 %v1256_v30, %v556_v33 }
 0x1c2   : > { %v776_v35 = vpop.f32.mrf.mxu1  ;;  %v914_v41 = vsel %vm912_vm9, %v774_v28, %v908_v26  ;;  %v916_v49 = vsel %vm912_vm9, 4, %v910_v48  ;;  %v860_v52 = vadd.f32 %v858_v25, %v1616_v27  ;;  %v911_v55 = vsel %vm907_vm8, 3, %v905_v15 }
 0x1c3   : > { %v777_v36 = vadd.f32 %v776_v35, %v1588_v31  ;;  %vm918_vm11 = vcmp.gt.f32.partialorder %v782_v40, %v914_v41  ;;  %v713_v31 = vadd.f32 %v1594_v37, %v1574_v4  ;;  %v863_v37 = vmul.f32 %v1598_v44, %v721_v39 }
 0x1c4   : > { %v1259_v47 = vpop.f32.mrf.mxu1  ;;  %v920_v57 = vsel %vm918_vm11, %v782_v40, %v914_v41  ;;  %v922_v60 = vsel %vm918_vm11, 5, %v916_v49 }
 0x1c5   : > { %vm913_vm10 = vcmp.gt.f32.partialorder %v777_v36, %v909_v45  ;;  %v798_v56 = vadd.f32 %v1259_v47, %v571_v50  ;;  %v859_v62 = vmul.f32 %v1590_v32, %v713_v31  ;;  %v865_v14 = vadd.f32 %v863_v37, %v1614_v21 }
 0x1c6   : > { %v915_v6 = vsel %vm913_vm10, %v777_v36, %v909_v45  ;;  %v789_v34 = vpop.f32.mrf.mxu1  ;;  %v917_v0 = vsel %vm913_vm10, 4, %v911_v55 }
 0x1c7   : > { %v790_v54 = vadd.f32 %v789_v34, %v561_v7  ;;  %vm919_vm13 = vcmp.gt.f32.partialorder %v785_v53, %v915_v6  ;;  %v861_v20 = vadd.f32 %v859_v62, %v1616_v27 }
 0x1c8   : > { %v1309_v4 = vpop.eup %1308  ;;  %v1260_v58 = vpop.f32.mrf.mxu1  ;;  %v921_v17 = vsel %vm919_vm13, %v785_v53, %v915_v6  ;;  %v923_v28 = vsel %vm919_vm13, 5, %v917_v0 }
 0x1c9   : > { %v856_v59 = vmul.f32 %v1309_v4, %v1605_v63  ;;  %vm924_vm12 = vcmp.gt.f32.partialorder %v790_v54, %v920_v57  ;;  %v801_v21 = vadd.f32 %v1260_v58, %v576_v18 }
 0x1ca   : > { %v1311_v61 = vpop.eup %1310  ;;  %v926_v1 = vsel %vm924_vm12, %v790_v54, %v920_v57  ;;  %v928_v3 = vsel %vm924_vm12, 6, %v922_v60  ;;  %v792_v9 = vpop.f32.mrf.mxu1 }
 0x1cb   : > { %v866_v11 = vmul.f32 0.5, %v856_v59  ;;  %v840_v12 = vmul.f32 %v1311_v61, %v1596_v43  ;;  %vm930_vm15 = vcmp.gt.f32.partialorder %v798_v56, %v926_v1  ;;  %v793_v63 = vadd.f32 %v792_v9, %v566_v46 }
 0x1cc   : > { %v1313_v13 = vpop.eup %1312  ;;  %v932_v10 = vsel %vm930_vm15, %v798_v56, %v926_v1  ;;  %v934_v16 = vsel %vm930_vm15, 7, %v928_v3 }
 0x1cd   : > { %v868_v19 = vsub.f32 %v864_v51, %v866_v11  ;;  %v874_v22 = vadd.f32 %v866_v11, %v864_v51  ;;  %v880_v8 = vmul.f32 0.5, %v840_v12  ;;  %v857_v23 = vmul.f32 %v1313_v13, %v1598_v44  ;;  %1203 = vst [vmem:[%s1662_s18 + $0x40] sm:$0xff] %v932_v10  ;;  %957 = vst [vmem:[%s1666_s19] sm:$0xff] %v934_v16 }
 0x1ce   : > { %v1315_v43 = vpop.eup %1314  ;;  %vm925_vm0 = vcmp.gt.f32.partialorder %v793_v63, %v921_v17 }
 0x1cf   : > { %v870_v30 = vmax.f32 %v868_v19, 0.0  ;;  %v876_v33 = vmax.f32 %v874_v22, 0.0  ;;  %v882_v7 = vsub.f32 %v860_v52, %v880_v8  ;;  %v888_v44 = vadd.f32 %v880_v8, %v860_v52 }
 0x1d0   : > { %v867_v5 = vmul.f32 0.5, %v857_v23  ;;  %v841_v26 = vmul.f32 %v1315_v43, %v1590_v32  ;;  %v927_v24 = vsel %vm925_vm0, %v793_v63, %v921_v17  ;;  %v929_v29 = vsel %vm925_vm0, 6, %v923_v28 }
 0x1d1   : > { %v872_v35 = vmin.f32 %v870_v30, 15.0  ;;  %v878_v38 = vmin.f32 %v876_v33, 15.0  ;;  %v884_v25 = vmax.f32 %v882_v7, 0.0  ;;  %v890_v27 = vmax.f32 %v888_v44, 0.0 }
 0x1d2   : > { %v869_v40 = vsub.f32 %v865_v14, %v867_v5  ;;  %v875_v41 = vadd.f32 %v867_v5, %v865_v14  ;;  %v881_v36 = vmul.f32 0.5, %v841_v26  ;;  %vm931_vm1 = vcmp.gt.f32.partialorder %v801_v21, %v927_v24 }
 0x1d3   : > { %v886_v39 = vmin.f32 %v884_v25, 15.0  ;;  %v892_v42 = vmin.f32 %v890_v27, 15.0  ;;  %943 = vst [vmem:[%s1662_s18] sm:$0xff] %v872_v35  ;;  %1199 = vst [vmem:[%s1662_s18 + $0x20] sm:$0xff] %v878_v38  ;;  %v933_v45 = vsel %vm931_vm1, %v801_v21, %v927_v24  ;;  %v935_v32 = vsel %vm931_vm1, 7, %v929_v29 }
 0x1d4   : > { %v871_v47 = vmax.f32 %v869_v40, 0.0  ;;  %v877_v15 = vmax.f32 %v875_v41, 0.0  ;;  %v883_v48 = vsub.f32 %v861_v20, %v881_v36  ;;  %v889_v31 = vadd.f32 %v881_v36, %v861_v20  ;;  %958 = vst [vmem:[%s1666_s19 + $0x8] sm:$0xff] %v935_v32  ;;  %v1034_v58 = vld [vmem:[%s1662_s18 + $0x40] sm:$0xff] (%p1411_p4) }
 0x1d5   : > { %1197 = vst [vmem:[%s1662_s18 + $0x10] sm:$0xff] %v886_v39  ;;  %1201 = vst [vmem:[%s1662_s18 + $0x30] sm:$0xff] %v892_v42  ;;  %v942_v49 = vsel %vm940_vm14, %v933_v45, -1e+30 }
 0x1d6   : > { %v873_v6 = vmin.f32 %v871_v47, 15.0  ;;  %v879_v34 = vmin.f32 %v877_v15, 15.0  ;;  %v885_v46 = vmax.f32 %v883_v48, 0.0  ;;  %v891_v50 = vmax.f32 %v889_v31, 0.0  ;;  %1204 = vst [vmem:[%s1662_s18 + $0x48] sm:$0xff] %v942_v49  ;;  %969 = sbr.rel (!%p1411_p4) target bundleno = 484 (0x1e4), region = 52 }
 0x1d7   : > { %1035 = vst [vmem:[%s971_s23 + $0x80] sm:$0xff] (%p1411_p4), %v1034_v58 }
 0x1d8   : > { %v887_v51 = vmin.f32 %v885_v46, 15.0  ;;  %v893_v52 = vmin.f32 %v891_v50, 15.0  ;;  %944 = vst [vmem:[%s1662_s18 + $0x8] sm:$0xff] %v873_v6  ;;  %1200 = vst [vmem:[%s1662_s18 + $0x28] sm:$0xff] %v879_v34 }
 0x1da   : > { %1198 = vst [vmem:[%s1662_s18 + $0x18] sm:$0xff] %v887_v51  ;;  %1202 = vst [vmem:[%s1662_s18 + $0x38] sm:$0xff] %v893_v52  ;;  %v1018_v2 = vld [vmem:[%s1662_s18] sm:$0xff] (%p1411_p4) }
 0x1db   : > { %v1026_v37 = vld [vmem:[%s1662_s18 + $0x20] sm:$0xff]  ;;  %1019 = vst [vmem:[%s971_s23] sm:$0xff] %v1018_v2 }
 0x1dc   : > { %v1022_v54 = vld [vmem:[%s1662_s18 + $0x10] sm:$0xff]  ;;  %1027 = vst [vmem:[%s971_s23 + $0x40] sm:$0xff] %v1026_v37 }
 0x1dd   : > { %1023 = vst [vmem:[%s971_s23 + $0x20] sm:$0xff] %v1022_v54  ;;  %v1030_v56 = vld [vmem:[%s1662_s18 + $0x30] sm:$0xff]  ;;  %v1036_v59 = vld [vmem:[%s1662_s18 + $0x48] sm:$0xff] }
 0x1de   : > { %1031 = vst [vmem:[%s971_s23 + $0x60] sm:$0xff] %v1030_v56  ;;  %1037 = vst [vmem:[%s971_s23 + $0x90] sm:$0xff] %v1036_v59 }
 0x1df   : > { %v1020_v53 = vld [vmem:[%s1662_s18 + $0x8] sm:$0xff] }
 0x1e0   : > { %v1028_v55 = vld [vmem:[%s1662_s18 + $0x28] sm:$0xff]  ;;  %1021 = vst [vmem:[%s971_s23 + $0x10] sm:$0xff] %v1020_v53 }
 0x1e1   : > { %v1024_v4 = vld [vmem:[%s1662_s18 + $0x18] sm:$0xff]  ;;  %1029 = vst [vmem:[%s971_s23 + $0x50] sm:$0xff] %v1028_v55 }
 0x1e2   : > { %1025 = vst [vmem:[%s971_s23 + $0x30] sm:$0xff] %v1024_v4  ;;  %v1032_v57 = vld [vmem:[%s1662_s18 + $0x38] sm:$0xff] }
 0x1e3   : > { %1033 = vst [vmem:[%s971_s23 + $0x70] sm:$0xff] %v1032_v57 }
 0x1e4 PF: > { %1043 = sbr.rel (!%p1411_p4) target bundleno = 489 (0x1e9), region = 90  ;;  %s1207_s24 = sshll.u32 (%p1411_p4), %s1399_s30, 3  ;;  %v1076_v60 = vld [vmem:[%s1666_s19] sm:$0xff] (%p1411_p4)  ;;  %v1078_v61 = vld [vmem:[%s1666_s19 + $0x8] sm:$0xff] (%p1411_p4) }
 0x1e5   : > { %s1045_s29 = scalar_lea.vmem (%p1411_p4), %s1726_s8, %s1207_s24 }
 0x1e6   : > { %1077 = vst [vmem:[%s1045_s29] sm:$0xff] (%p1411_p4), %v1076_v60  ;;  %1079 = vst [vmem:[%s1045_s29 + $0x10] sm:$0xff] (%p1411_p4), %v1078_v61 }
 0x1e9 PF: > { %p16_p8 = scmp.ge.s32.totalorder %s1401_s9, 4   ;;  %s1728_s27 = smov %s1334_s28 }
 0x1ea   : > { %s1729_s28 = smov %s1409_s12  ;;  %s1730_s29 = smov %s1401_s9 }
 0x1eb   :  { %18 = sbr.rel (!%p16_p8) target bundleno = 2 (0x2), region = 170 }

</bundles_post_ra>
